<compile_context>
chip_gen: v7x
topology: tpu7x:2x2x1
jax: 0.10.0
libtpu: 0.0.40
codegen_flags: <defaults>
</compile_context>

<pallas_src>
import functools

import jax
import jax.numpy as jnp
from jax.experimental import pallas as pl
from jax.experimental.pallas import tpu as pltpu

LANE = 128
SUBLANE = 8


def _round_up(x, m):
    return (x + m - 1) // m * m


def mlp_kernel(x_ref, w1_ref, b1_ref, w2_ref, b2_ref, o_ref):
    # x_ref : (TB, in_pad)          f32    (batch tile; cast to bf16 in-kernel)
    # w1_ref: (in_pad, hidden_pad)  bf16   (pinned / VMEM-resident across steps)
    # b1_ref: (1, hidden_pad)       f32
    # w2_ref: (hidden_pad, out_pad) bf16   (pinned)
    # b2_ref: (1, out_pad)          f32
    # o_ref : (TB, out_pad)         bf16   (lane-dense: out_pad % 128 == 0)
    x = x_ref[...].astype(jnp.bfloat16)

    # linear1 on the MXU (bf16 operands, f32 accumulation); bias + ReLU epilogue in
    # f32 on the VPU (f32 everywhere incl. v5e, which lacks bf16 VPU).
    h = jnp.dot(x, w1_ref[...], preferred_element_type=jnp.float32)
    h = jnp.maximum(h + b1_ref[...], 0.0)

    # linear2 on the MXU; store in bf16 (halves output HBM traffic).
    out = jnp.dot(h.astype(jnp.bfloat16), w2_ref[...],
                  preferred_element_type=jnp.float32)
    o_ref[...] = (out + b2_ref[...]).astype(o_ref.dtype)


def prepare_params(w1, b1, w2, b2):
    """One-time (model-load time) parameter prep.

    PyTorch convention in: w1 (hidden, in), b1 (hidden,), w2 (out, hidden), b2 (out,).
    Pads feature dims up to multiples of 128 (zero-padding is exact for linear+ReLU),
    transposes to (in, out) layout for `x @ W`, casts matmul operands to bf16.
    """
    hidden, in_size = w1.shape
    out_size = w2.shape[0]
    in_pad = _round_up(in_size, LANE)
    hidden_pad = _round_up(hidden, LANE)
    out_pad = _round_up(out_size, LANE)

    w1_t = jnp.zeros((in_pad, hidden_pad), jnp.float32)
    w1_t = w1_t.at[:in_size, :hidden].set(jnp.asarray(w1, jnp.float32).T)
    w2_t = jnp.zeros((hidden_pad, out_pad), jnp.float32)
    w2_t = w2_t.at[:hidden, :out_size].set(jnp.asarray(w2, jnp.float32).T)
    b1_p = jnp.zeros((1, hidden_pad), jnp.float32)
    b1_p = b1_p.at[0, :hidden].set(jnp.asarray(b1, jnp.float32))
    b2_p = jnp.zeros((1, out_pad), jnp.float32)
    b2_p = b2_p.at[0, :out_size].set(jnp.asarray(b2, jnp.float32))

    return {
        "w1": w1_t.astype(jnp.bfloat16),
        "b1": b1_p,
        "w2": w2_t.astype(jnp.bfloat16),
        "b2": b2_p,
        "in_size": in_size,
        "out_size": out_size,
    }


def make_forward(params, *, batch_tile=2048):
    """Returns a jitted forward(x) closure over prepared params.

    x: (B, C, H, W) or (B, in_size), f32. Returns (B, out_size) bf16 logits.
    """
    w1, b1, w2, b2 = params["w1"], params["b1"], params["w2"], params["b2"]
    in_size, out_size = params["in_size"], params["out_size"]
    in_pad, hidden_pad = w1.shape
    out_pad = w2.shape[1]

    @jax.jit
    def forward(x):
        B = x.shape[0]
        x2d = x.reshape(B, -1).astype(jnp.float32)     # x.view(x.size(0), -1)
        assert x2d.shape[1] == in_size

        # Balanced batch tiling: at least 2 grid steps whenever B >= 16 (so the
        # "parallel" axis engages both TCs on v7x), tiles capped at `batch_tile`,
        # dead rows capped at <8 per tile.
        min_tiles = 2 if B >= 2 * SUBLANE else 1
        num_tiles = max(pl.cdiv(B, batch_tile), min_tiles)
        tb = _round_up(pl.cdiv(B, num_tiles), SUBLANE)
        b_pad = tb * num_tiles

        # Pad only when actually required (no-op pass otherwise; in_size=256 is
        # already lane-aligned for MNIST-style inputs). Padding stays f32 so the
        # kernel's single HBM read is the only pass over the activations.
        if b_pad != B or in_pad != in_size:
            x2d = jnp.pad(x2d, ((0, b_pad - B), (0, in_pad - in_size)))

        out = pl.pallas_call(
            mlp_kernel,
            out_shape=jax.ShapeDtypeStruct((b_pad, out_pad), jnp.bfloat16),
            grid_spec=pltpu.PrefetchScalarGridSpec(
                num_scalar_prefetch=0,
                grid=(num_tiles,),
                in_specs=[
                    pl.BlockSpec((tb, in_pad), lambda i: (i, 0)),          # x tile
                    pl.BlockSpec((in_pad, hidden_pad), lambda i: (0, 0)),  # W1 (pinned)
                    pl.BlockSpec((1, hidden_pad), lambda i: (0, 0)),       # b1 (pinned)
                    pl.BlockSpec((hidden_pad, out_pad), lambda i: (0, 0)), # W2 (pinned)
                    pl.BlockSpec((1, out_pad), lambda i: (0, 0)),          # b2 (pinned)
                ],
                out_specs=pl.BlockSpec((tb, out_pad), lambda i: (i, 0)),
            ),
            compiler_params=pltpu.CompilerParams(
                dimension_semantics=("parallel",),      # batch tiles -> both TCs on v7x
                vmem_limit_bytes=32 * 1024 * 1024,      # safe on all gens incl. v7x
            ),
        )(x2d, w1, b1, w2, b2)

        # Slice inside jit so it fuses with the dispatch instead of being a separate
        # executable; consumers wanting zero extra passes can take the padded block.
        return out[:B, :out_size]

    return forward


def _init_linear(key, out_features, in_features):
    # Mirrors nn.Linear default init: U(-1/sqrt(in), 1/sqrt(in)) for W and b.
    kw, kb = jax.random.split(key)
    bound = 1.0 / jnp.sqrt(jnp.float32(in_features))
    w = jax.random.uniform(kw, (out_features, in_features), jnp.float32,
                           minval=-bound, maxval=bound)
    b = jax.random.uniform(kb, (out_features,), jnp.float32,
                           minval=-bound, maxval=bound)
    return w, b


if __name__ == "__main__":
    key = jax.random.PRNGKey(0)
    kx, k1, k2, kx2 = jax.random.split(key, 4)

    # MNIST-like small shapes: 1x16x16 images -> in_size=256, hidden=32, out=10.
    C, H, W = 1, 16, 16
    in_size = C * H * W
    hidden_size = 32
    out_size = 10

    w1, b1 = _init_linear(k1, hidden_size, in_size)
    w2, b2 = _init_linear(k2, out_size, hidden_size)
    params = prepare_params(w1, b1, w2, b2)        # done once at "model load"
    forward = make_forward(params)                 # jitted forward closure

    def ref_fn(xin):
        # Same bf16-operand / f32-accumulate semantics as the kernel.
        x2d = xin.reshape(xin.shape[0], -1)
        h = jnp.maximum(
            jnp.dot(x2d.astype(jnp.bfloat16), w1.T.astype(jnp.bfloat16),
                    preferred_element_type=jnp.float32) + b1, 0.0)
        return jnp.dot(h.astype(jnp.bfloat16), w2.T.astype(jnp.bfloat16),
                       preferred_element_type=jnp.float32) + b2

    # Small batch (single grid step).
    x_small = jax.random.normal(kx, (8, C, H, W), jnp.float32)
    out_small = jax.block_until_ready(forward(x_small))
    assert out_small.shape == (8, out_size)
    assert jnp.allclose(out_small.astype(jnp.float32), ref_fn(x_small),
                        atol=3e-2, rtol=3e-2)

    # Larger ragged batch: exercises balanced multi-tile grid + batch zero-padding.
    x_big = jax.random.normal(kx2, (300, C, H, W), jnp.float32)
    out_big = jax.block_until_ready(forward(x_big))
    assert out_big.shape == (300, out_size)
    assert jnp.allclose(out_big.astype(jnp.float32), ref_fn(x_big),
                        atol=3e-2, rtol=3e-2)

    print("KERNEL_OK")
</pallas_src>

<mosaic_0001>
module attributes {stable_mosaic.version = 11 : i64} {
  func.func @mlp_kernel(%arg0: i32, %arg1: memref<8x256xf32, #tpu.memory_space<vmem>>, %arg2: memref<256x128xbf16, #tpu.memory_space<vmem>>, %arg3: memref<1x128xf32, #tpu.memory_space<vmem>>, %arg4: memref<128x128xbf16, #tpu.memory_space<vmem>>, %arg5: memref<1x128xf32, #tpu.memory_space<vmem>>, %arg6: memref<8x128xbf16, #tpu.memory_space<vmem>>) attributes {dimension_semantics = [#tpu.dimension_semantics<parallel>], iteration_bounds = array<i64: 1>, scalar_prefetch = 0 : i64, scratch_operands = 0 : i64, tpu.core_type = #tpu.core_type<tc>, window_params = [{transform_indices = @transform_0, window_bounds = array<i64: 8, 256>}, {pipeline_mode = #tpu.pipeline_mode<synchronous>, transform_indices = @transform_1, window_bounds = array<i64: 256, 128>}, {pipeline_mode = #tpu.pipeline_mode<synchronous>, transform_indices = @transform_2, window_bounds = array<i64: 1, 128>}, {pipeline_mode = #tpu.pipeline_mode<synchronous>, transform_indices = @transform_3, window_bounds = array<i64: 128, 128>}, {pipeline_mode = #tpu.pipeline_mode<synchronous>, transform_indices = @transform_4, window_bounds = array<i64: 1, 128>}, {transform_indices = @transform_5, window_bounds = array<i64: 8, 128>}]} {
    %c0 = arith.constant 0 : index
    %c0_0 = arith.constant 0 : index
    %0 = vector.load %arg1[%c0, %c0_0] : memref<8x256xf32, #tpu.memory_space<vmem>>, vector<8x256xf32>
    %1 = arith.truncf %0 : vector<8x256xf32> to vector<8x256xbf16>
    %c0_1 = arith.constant 0 : index
    %c0_2 = arith.constant 0 : index
    %2 = vector.load %arg2[%c0_1, %c0_2] : memref<256x128xbf16, #tpu.memory_space<vmem>>, vector<256x128xbf16>
    %cst = arith.constant dense<0.000000e+00> : vector<8x128xf32>
    %3 = tpu.matmul %1, %2, %cst {dimension_numbers = #tpu.dot_dimension_numbers<[1], [0], [0], [1], [0, 0, 1, 1], [], []>} : vector<8x256xbf16>, vector<256x128xbf16>, vector<8x128xf32> -> vector<8x128xf32>
    %c0_3 = arith.constant 0 : index
    %c0_4 = arith.constant 0 : index
    %4 = vector.load %arg3[%c0_3, %c0_4] : memref<1x128xf32, #tpu.memory_space<vmem>>, vector<1x128xf32>
    %5 = vector.broadcast %4 : vector<1x128xf32> to vector<8x128xf32>
    %6 = arith.addf %3, %5 : vector<8x128xf32>
    %cst_5 = arith.constant 0.000000e+00 : f32
    %7 = vector.broadcast %cst_5 : f32 to vector<8x128xf32>
    %8 = arith.maximumf %6, %7 : vector<8x128xf32>
    %9 = arith.truncf %8 : vector<8x128xf32> to vector<8x128xbf16>
    %c0_6 = arith.constant 0 : index
    %c0_7 = arith.constant 0 : index
    %10 = vector.load %arg4[%c0_6, %c0_7] : memref<128x128xbf16, #tpu.memory_space<vmem>>, vector<128x128xbf16>
    %cst_8 = arith.constant dense<0.000000e+00> : vector<8x128xf32>
    %11 = tpu.matmul %9, %10, %cst_8 {dimension_numbers = #tpu.dot_dimension_numbers<[1], [0], [0], [1], [0, 0, 1, 1], [], []>} : vector<8x128xbf16>, vector<128x128xbf16>, vector<8x128xf32> -> vector<8x128xf32>
    %c0_9 = arith.constant 0 : index
    %c0_10 = arith.constant 0 : index
    %12 = vector.load %arg5[%c0_9, %c0_10] : memref<1x128xf32, #tpu.memory_space<vmem>>, vector<1x128xf32>
    %13 = vector.broadcast %12 : vector<1x128xf32> to vector<8x128xf32>
    %14 = arith.addf %11, %13 : vector<8x128xf32>
    %15 = arith.truncf %14 : vector<8x128xf32> to vector<8x128xbf16>
    %c0_11 = arith.constant 0 : index
    %c0_12 = arith.constant 0 : index
    %16 = vector.load %arg6[%c0_11, %c0_12] : memref<8x128xbf16, #tpu.memory_space<vmem>>, vector<8x128xbf16>
    tpu.vector_store %arg6[%c0_11, %c0_12], %15 {strides = array<i32>} : memref<8x128xbf16, #tpu.memory_space<vmem>>, vector<8x128xbf16>,
    return
  }
  func.func @transform_0(%arg0: i32) -> (i32, i32) {
    %c0_i32 = arith.constant 0 : i32
    %c0_i32_0 = arith.constant 0 : i32
    return %arg0, %c0_i32 : i32, i32
  }
  func.func @transform_1(%arg0: i32) -> (i32, i32) {
    %c0_i32 = arith.constant 0 : i32
    %c0_i32_0 = arith.constant 0 : i32
    %c0_i32_1 = arith.constant 0 : i32
    return %c0_i32, %c0_i32_0 : i32, i32
  }
  func.func @transform_2(%arg0: i32) -> (i32, i32) {
    %c0_i32 = arith.constant 0 : i32
    %c0_i32_0 = arith.constant 0 : i32
    %c0_i32_1 = arith.constant 0 : i32
    return %c0_i32, %c0_i32_0 : i32, i32
  }
  func.func @transform_3(%arg0: i32) -> (i32, i32) {
    %c0_i32 = arith.constant 0 : i32
    %c0_i32_0 = arith.constant 0 : i32
    %c0_i32_1 = arith.constant 0 : i32
    return %c0_i32, %c0_i32_0 : i32, i32
  }
  func.func @transform_4(%arg0: i32) -> (i32, i32) {
    %c0_i32 = arith.constant 0 : i32
    %c0_i32_0 = arith.constant 0 : i32
    %c0_i32_1 = arith.constant 0 : i32
    return %c0_i32, %c0_i32_0 : i32, i32
  }
  func.func @transform_5(%arg0: i32) -> (i32, i32) {
    %c0_i32 = arith.constant 0 : i32
    %c0_i32_0 = arith.constant 0 : i32
    return %arg0, %c0_i32 : i32, i32
  }
}

</mosaic_0001>

<bundles_post_ra>
// kernel: forward.1
= control target key start
LH: loop header
LB: loop body
LE: loop exit
PB: predicated region body
PF: predicated region fallthrough
CT: control target
= control target key end

     0   :  { %10 = vsyncpa [#allocation3], 0  ;;  %s629_s0 = inlined_call_operand.vmem [shape: f32[8,256], index: 0, kind: input, shape index: {}]   ;;  %s630_s1 = inlined_call_operand.vmem [shape: bf16[256,128], index: 1, kind: input, shape index: {}]   ;;  %s631_s2 = inlined_call_operand.vmem [shape: f32[1,128], index: 2, kind: input, shape index: {}]   ;;  %s632_s3 = inlined_call_operand.hbm [shape: bf16[128,128], index: 3, kind: input, shape index: {}]   ;;  %s633_s4 = inlined_call_operand.vmem [shape: f32[1,128], index: 4, kind: input, shape index: {}]   ;;  %s634_s5 = inlined_call_operand.hbm [shape: bf16[8,128], index: 5, kind: output, shape index: {}]  }
   0x1   :  { %11 = vsyncpa [#allocation4], 0  ;;  %s500_s18 = smov [#allocation2]   ;;  %s452_s22 = scalar_lea.hbm %s632_s3, 1024 }
   0x2   :  { %s23_s19 = sshll.u32 %s500_s18, 4  ;;  %p453_p0 = scmp.ne.s32.totalorder %s632_s3, %s452_s22  ;;  %s24_s19 = int_to_ptr.vmem [resolvable:$true] %s23_s19 }
   0x3   :  { %p456_p1 = scmp.lt.u32.totalorder %s452_s22, %s632_s3 }
   0x5   :  { %p458_p2 = pnand %p456_p1, %p453_p0 }
   0x7   :  { %461 = shalt.err (!%p458_p2)
}
   0x8   :  { %s462_s27 = scalar_lea.vmem %s24_s19, 1024  ;;  %p467_p4 = scmp.lt.s32.totalorder %s24_s19, %s24_s19 }
   0x9   :  { %p463_p3 = scmp.ne.s32.totalorder %s24_s19, %s462_s27  ;;  %p468_p5 = scmp.lt.s32.totalorder %s462_s27, %s462_s27 }
   0xb   :  { %p469_p6 = por %p468_p5, %p467_p4 }
   0xd   :  { %p470_p7 = pnand %p469_p6, %p463_p3 }
   0xf   :  { %473 = shalt.err (!%p470_p7)
}
  0x10   :  { %s501_s28 = smov 64   ;;  %s502_s29 = smov 4  }
  0x11   :  { %29 = dma.hbm_to_vmem [thread:$0]  %s632_s3, 1024, %s24_s19, [#allocation3], %s501_s28, %s501_s28, %s502_s29  }
  0x12   :  { %496 = dma.done.wait [#allocation3], 1024  }
  0x13   :  { %497 = vsyncadd [#allocation3], 4294966272  ;;  %v503_v0 = vmov 0.0   ;;  %v428_v1 = vld [vmem:[%s630_s1 + $0x40] sm:$0xff]   ;;  %v430_v3 = vld [vmem:[%s630_s1 + $0x48] sm:$0xff]   ;;  %vm504_vm0 = vmmov 0  }
  0x14   :  { %402 = vmatprep.subr.bf16.mxu1 %v503_v0  ;;  %v429_v2 = vld [vmem:[%s630_s1] sm:$0xff]   ;;  %371 = vmatprep.subr.bf16.mxu0 %v428_v1  ;;  %v431_v4 = vld [vmem:[%s630_s1 + $0x8] sm:$0xff]   ;;  %v432_v5 = vld [vmem:[%s630_s1 + $0x50] sm:$0xff]   ;;  %s505_s18 = smov [#allocation5]  }
  0x15   :  { %372 = vmatpush3.bf16.msra.mxu0 %v429_v2  ;;  %v433_v6 = vld [vmem:[%s630_s1 + $0x10] sm:$0xff]   ;;  %v434_v7 = vld [vmem:[%s630_s1 + $0x58] sm:$0xff]   ;;  %v436_v9 = vld [vmem:[%s630_s1 + $0x60] sm:$0xff]   ;;  %418 = vmatprep.mubr.msk.bf16.mxu1 %vm504_vm0, %v503_v0  ;;  %s336_s19 = sshll.u32 %s505_s18, 4  ;;  %s337_s19 = int_to_ptr.vmem [resolvable:$true] %s336_s19 }
  0x16   :  { %373 = vmatprep.subr.bf16.mxu0 %v430_v3  ;;  %v435_v8 = vld [vmem:[%s630_s1 + $0x18] sm:$0xff]   ;;  %v437_v10 = vld [vmem:[%s630_s1 + $0x20] sm:$0xff]   ;;  %v438_v11 = vld [vmem:[%s630_s1 + $0x68] sm:$0xff]   ;;  %p479_p9 = scmp.lt.s32.totalorder %s337_s19, %s337_s19 }
  0x17   :  { %v37_v12 = vld [vmem:[%s629_s0 + $0x8] sm:$0xff]  ;;  %v444_v14 = vld [vmem:[#allocation2] sm:$0xff]   ;;  %v440_v16 = vld [vmem:[%s630_s1 + $0x70] sm:$0xff]  }
  0x18   :  { %v39_v13 = vpack.c.bf16 %v37_v12, %v37_v12  ;;  %v439_v15 = vld [vmem:[%s630_s1 + $0x28] sm:$0xff]   ;;  %403 = vmatpush3.bf16.msra.mxu1 %v444_v14  ;;  %v441_v18 = vld [vmem:[%s630_s1 + $0x30] sm:$0xff]   ;;  %v442_v19 = vld [vmem:[%s630_s1 + $0x78] sm:$0xff]  }
  0x19   :  { %374 = vmatpush3.bf16.msra.mxu0 %v431_v4  ;;  %v445_v17 = vld [vmem:[#allocation2 + $0x8] sm:$0xff]   ;;  %404 = vmatprep.subr.bf16.mxu1 %v503_v0  ;;  %v446_v20 = vld [vmem:[#allocation2 + $0x10] sm:$0xff]   ;;  %v443_v21 = vld [vmem:[%s630_s1 + $0x38] sm:$0xff]  }
  0x1a   :  { %375 = vmatprep.subr.bf16.mxu0 %v432_v5  ;;  %207 = vmatprep.mubr.bf16.mxu0 %v39_v13  ;;  %v36_v22 = vld [vmem:[%s629_s0] sm:$0xff]  ;;  %v447_v23 = vld [vmem:[#allocation2 + $0x18] sm:$0xff]   ;;  %v449_v26 = vld [vmem:[#allocation2 + $0x28] sm:$0xff]  }
  0x1b   :  { %v38_v24 = vpack.c.bf16 %v36_v22, %v36_v22  ;;  %v448_v25 = vld [vmem:[#allocation2 + $0x20] sm:$0xff]   ;;  %v450_v27 = vld [vmem:[#allocation2 + $0x30] sm:$0xff]   ;;  %v451_v28 = vld [vmem:[#allocation2 + $0x38] sm:$0xff]  }
  0x1c   :  { %405 = vmatpush3.bf16.msra.mxu1 %v445_v17  ;;  %v345_v30 = vld [vmem:[%s631_s2] ss:$0 sm:$0xff]  ;;  %s474_s2 = scalar_lea.vmem %s337_s19, 64 }
  0x1d   :  { %376 = vmatpush3.bf16.msra.mxu0 %v433_v6  ;;  %406 = vmatprep.subr.bf16.mxu1 %v503_v0  ;;  %v362_v38 = vld [vmem:[%s633_s4] ss:$0 sm:$0xff]  ;;  %p475_p8 = scmp.ne.s32.totalorder %s337_s19, %s474_s2  ;;  %p480_p10 = scmp.lt.s32.totalorder %s474_s2, %s474_s2 }
  0x1e   :  { %377 = vmatprep.subr.bf16.mxu0 %v434_v7 }
  0x1f   :  { %p481_p11 = por %p480_p10, %p479_p9 }
  0x20   :  { %407 = vmatpush3.bf16.msra.mxu1 %v446_v20 }
  0x21   :  { %378 = vmatpush3.bf16.msra.mxu0 %v435_v8  ;;  %408 = vmatprep.subr.bf16.mxu1 %v503_v0  ;;  %p482_p12 = pnand %p481_p11, %p475_p8 }
  0x22   :  { %379 = vmatprep.subr.bf16.mxu0 %v436_v9 }
  0x24   :  { %409 = vmatpush3.bf16.msra.mxu1 %v447_v23 }
  0x25   :  { %380 = vmatpush3.bf16.msra.mxu0 %v437_v10  ;;  %410 = vmatprep.subr.bf16.mxu1 %v503_v0 }
  0x26   :  { %381 = vmatprep.subr.bf16.mxu0 %v438_v11 }
  0x28   :  { %411 = vmatpush3.bf16.msra.mxu1 %v448_v25 }
  0x29   :  { %382 = vmatpush3.bf16.msra.mxu0 %v439_v15  ;;  %412 = vmatprep.subr.bf16.mxu1 %v503_v0 }
  0x2a   :  { %383 = vmatprep.subr.bf16.mxu0 %v440_v16 }
  0x2c   :  { %413 = vmatpush3.bf16.msra.mxu1 %v449_v26 }
  0x2d   :  { %384 = vmatpush3.bf16.msra.mxu0 %v441_v18  ;;  %414 = vmatprep.subr.bf16.mxu1 %v503_v0 }
  0x2e   :  { %385 = vmatprep.subr.bf16.mxu0 %v442_v19 }
  0x30   :  { %415 = vmatpush3.bf16.msra.mxu1 %v450_v27 }
  0x31   :  { %386 = vmatpush3.bf16.msra.mxu0 %v443_v21  ;;  %416 = vmatprep.subr.bf16.mxu1 %v503_v0 }
  0x34   :  { %208 = vmatmul.mubr.bf16.vlgmr.msra.gmra.mrb[0].mxu0 %v38_v24  ;;  %417 = vmatpush3.bf16.msra.mxu1 %v451_v28 }
 0x107   :  { %v387_v29 = vpop.f32.mrb[0].mxu0 }
 0x108   :  { %v388_v31 = vpop.f32.mrb[1].mxu0 }
 0x109   :  { %v389_v32 = vadd.f32 %v388_v31, %v387_v29  ;;  %v390_v33 = vpop.f32.mrb[2].mxu0 }
 0x10a   :  { %v391_v34 = vpop.f32.mrb[3].mxu0 }
 0x10b   :  { %v210_v35 = vadd.f32 %v389_v32, %v345_v30 }
 0x10d   :  { %v215_v36 = vmax.f32 %v210_v35, 0.0 }
 0x10f   :  { %v216_v37 = vpack.c.bf16 %v215_v36, %v215_v36 }
 0x111   :  { %419 = vmatmul.mubr.bf16.vlgmr.msra.gmra.mrb[0].mxu1 %v216_v37 }
 0x1e4   :  { %v322_v39 = vpop.f32.mrb[0].mxu1 }
 0x1e5   :  { %v323_v40 = vadd.f32 %v362_v38, %v322_v39  ;;  %v420_v41 = vpop.f32.mrb[1].mxu1 }
 0x1e6   :  { %v325_v42 = vpop.f32.mrb[2].mxu1 }
 0x1e7   :  { %v328_v43 = vpack.c.bf16 %v323_v40, %v323_v40  ;;  %v421_v44 = vpop.f32.mrb[3].mxu1 }
 0x1e9   :  { %329 = vst [vmem:[#allocation5] sm:$0xf] %v328_v43 }
 0x1ea   :  { %485 = shalt.err (!%p482_p12)
}
 0x1eb   :  { %s486_s4 = scalar_lea.hbm %s634_s5, 64 }
 0x1ec   :  { %p487_p13 = scmp.ne.s32.totalorder %s634_s5, %s486_s4  ;;  %p490_p0 = scmp.lt.u32.totalorder %s486_s4, %s634_s5 }
 0x1ee   :  { %p492_p1 = pnand %p490_p0, %p487_p13 }
 0x1f0   :  { %495 = shalt.err (!%p492_p1)
}
 0x1f1   :  { %339 = dma.vmem_to_hbm [thread:$0]  %s337_s19, 64, %s634_s5, [#allocation4]  }
 0x1f2   :  { %498 = dma.done.wait [#allocation4], 64  }
 0x1f3   :  { %499 = vsyncadd [#allocation4], 4294967232 }
 0x1f4   :  { %343 = vsyncpa [#allocation3], 1 }
 0x1f5   :  { %344 = vsyncpa [#allocation4], 1 }

</bundles_post_ra>
